<compile_context>
chip_gen: v7x
topology: tpu7x:2x2x1
jax: 0.10.0
libtpu: 0.0.40
codegen_flags: <defaults>
</compile_context>

<pallas_src>
import functools

import jax
import jax.numpy as jnp
from jax.experimental import pallas as pl
from jax.experimental.pallas import tpu as pltpu


class Lambda:
    """Mirror of the PyTorch Lambda wrapper: applies `function` to the input."""

    def __init__(self, function):
        self.function = function

    def __call__(self, inputs):
        return self.function(inputs)


def _round_up(x, m):
    return ((x + m - 1) // m) * m


def _vmem_limit_bytes():
    """~3/4 of this chip's physical VMEM (v7x: 64 MiB, v5e/v6e: 128 MiB), capped."""
    cap = 128 * 1024 * 1024
    try:
        cap = int(getattr(pltpu.get_tpu_info(), "vmem_capacity_bytes", cap)) or cap
    except Exception:
        pass
    return max(32 * 1024 * 1024, min((cap * 3) // 4, 100 * 1024 * 1024))


def _dwsep_fused_kernel(xm_ref, xh_ref, w_ref, b_ref, o_ref, *, K, Wpp, TH):
    # xm_ref : (1, C_in, TH*Wpp)      main input rows of this tile (flat, lane-dense)
    # xh_ref : (1, C_in, (K-1)*Wpp)   K-1 halo rows just below the tile
    # w_ref  : (K*K, C_out, C_in)     fused per-tap weights  w_pw[c,o] * w_dw[kh,kw,c]
    # b_ref  : (C_out, 1) f32         fused bias  b_dw @ w_pw + b_pw
    # o_ref  : (1, C_out, TH*Wpp)     lane-dense output tile
    span = TH * Wpp
    slab_len = (TH + K - 1) * Wpp

    if K > 1:
        # Tile rows + halo rows, flat on the lane axis.  Both pieces are
        # 128-multiples, so the concat is tile-aligned (cheap).
        slab = jnp.concatenate([xm_ref[0], xh_ref[0]], axis=1)      # (C_in, slab_len)
    else:
        slab = xm_ref[0]

    c_out = o_ref.shape[1]
    acc = jnp.zeros((c_out, span), jnp.float32)
    for kw in range(K):
        # Residual lane shift by kw on the XLU: roll(x, n-kw) == roll(x, -kw), so
        # rolled[j] = slab[j + kw].  Elements that wrap (or bleed across a row)
        # only land in columns >= Wpp - kw >= Wv, which the wrapper discards.
        rolled = slab if kw == 0 else pltpu.roll(slab, shift=slab_len - kw, axis=1)
        for kh in range(K):
            tap = rolled[:, kh * Wpp: kh * Wpp + span]               # aligned slice
            acc = acc + jnp.dot(w_ref[kh * K + kw], tap,
                                preferred_element_type=jnp.float32)
    o_ref[0] = (acc + b_ref[...]).astype(o_ref.dtype)


def depthwise_separable_conv2d(x_nchw, w_dw, b_dw, w_pw, b_pw, *,
                               padding=0, stride=1, row_tile=8, hbm_dtype=None):
    """x_nchw: (B, C_in, H, W); w_dw: (K, K, C_in); b_dw: (C_in,);
    w_pw: (C_in, C_out); b_pw: (C_out,). Returns (B, C_out, H_out, W_out)."""
    B, C, H, W = x_nchw.shape
    K = w_dw.shape[0]
    C_out = w_pw.shape[1]
    p = padding

    Hp, Wp = H + 2 * p, W + 2 * p
    Hv, Wv = Hp - K + 1, Wp - K + 1              # stride-1 "valid" output extent
    H_out = (Hp - K) // stride + 1
    W_out = (Wp - K) // stride + 1

    # Lane-dense row pitch: every padded row starts on a 128-lane boundary, so
    # every kh*Wpp tap offset is aligned and the output stores are unmasked.
    Wpp = _round_up(Wp, 128)

    # Output-row tile.  TH is rounded up to a multiple of K-1 so the halo block
    # offset (t+1)*TH is a legal block index for a (K-1)-row halo BlockSpec.
    TH = max(1, min(row_tile, Hv))
    if K > 1:
        TH = _round_up(TH, K - 1)
    T = pl.cdiv(Hv, TH)
    span = TH * Wpp
    halo_rows = max(K - 1, 1)
    R_in = T * TH + (K - 1)                      # >= Hp; extra rows are zero
    L_flat = R_in * Wpp

    # Optional bf16 transport over HBM (accumulation stays f32 in-kernel).
    dt = jnp.dtype(hbm_dtype) if hbm_dtype is not None else x_nchw.dtype

    # Zero-pad spatially to (R_in, Wpp) and flatten spatial onto the lane axis.
    x_big = jnp.pad(x_nchw, ((0, 0), (0, 0),
                             (p, R_in - Hp + p), (p, Wpp - Wp + p)))
    x_flat = x_big.reshape(B, C, L_flat).astype(dt)

    # Fused per-tap weights: W_t[o, c] = w_pw[c, o] * w_dw[kh, kw, c],  t = kh*K+kw.
    # The fused bias folds the depthwise bias through the pointwise conv.
    wfused = (w_pw.T[None, :, :] * w_dw.reshape(K * K, C)[:, None, :]).astype(dt)
    b_fused = (b_dw @ w_pw + b_pw).reshape(C_out, 1).astype(jnp.float32)

    kernel = functools.partial(_dwsep_fused_kernel, K=K, Wpp=Wpp, TH=TH)
    halo_stride = TH // (K - 1) if K > 1 else 0

    out_flat = pl.pallas_call(
        kernel,
        out_shape=jax.ShapeDtypeStruct((B, C_out, T * span), x_nchw.dtype),
        grid=(B, T),
        in_specs=[
            # Main rows of tile t (no halo): block index t along the flat axis.
            pl.BlockSpec((1, C, span), lambda b, t: (b, 0, t)),
            # K-1 halo rows just below tile t (same array, smaller blocks).
            pl.BlockSpec((1, C, halo_rows * Wpp),
                         lambda b, t: (b, 0, (t + 1) * halo_stride)),
            pl.BlockSpec((K * K, C_out, C), lambda b, t: (0, 0, 0)),
            pl.BlockSpec((C_out, 1), lambda b, t: (0, 0)),
        ],
        out_specs=pl.BlockSpec((1, C_out, span), lambda b, t: (b, 0, t)),
        compiler_params=pltpu.CompilerParams(
            dimension_semantics=("parallel", "parallel"),
            vmem_limit_bytes=_vmem_limit_bytes()),
    )(x_flat, x_flat, wfused, b_fused)

    # Un-flatten, drop padded rows/columns, and apply stride by subsampling the
    # stride-1 result (pointwise 1x1 conv commutes with spatial subsampling).
    # TODO(synk): fold stride>1 into the kernel/grid (strided row tiles +
    # pl.ds(..., stride=s) on W) to avoid computing/writing skipped pixels.
    full = out_flat.reshape(B, C_out, T * TH, Wpp)
    return full[:, :, :Hv:stride, :Wv:stride][:, :, :H_out, :W_out]


def _reference(x_nchw, w_dw, b_dw, w_pw, b_pw, *, padding, stride):
    """Pure-JAX reference matching nn.Conv2d(groups=c_in) -> nn.Conv2d(1x1)."""
    C = x_nchw.shape[1]
    w1 = jnp.transpose(w_dw, (2, 0, 1))[:, None, :, :]           # OIHW (C,1,K,K)
    y = jax.lax.conv_general_dilated(
        x_nchw, w1, window_strides=(stride, stride),
        padding=((padding, padding), (padding, padding)),
        dimension_numbers=("NCHW", "OIHW", "NCHW"), feature_group_count=C,
        precision=jax.lax.Precision.HIGHEST)
    y = y + b_dw.reshape(1, -1, 1, 1)
    w2 = jnp.transpose(w_pw, (1, 0))[:, :, None, None]           # OIHW (C_out,C,1,1)
    z = jax.lax.conv_general_dilated(
        y, w2, window_strides=(1, 1), padding=((0, 0), (0, 0)),
        dimension_numbers=("NCHW", "OIHW", "NCHW"),
        precision=jax.lax.Precision.HIGHEST)
    return z + b_pw.reshape(1, -1, 1, 1)


if __name__ == "__main__":
    B, C_in, C_out, H, W, K = 2, 4, 8, 16, 16, 3
    padding, stride = 1, 1

    key = jax.random.PRNGKey(0)
    kx, k1, k2, k3, k4 = jax.random.split(key, 5)

    x = jax.random.normal(kx, (B, C_in, H, W), dtype=jnp.float32)
    # Parameter shapes mirror nn.Conv2d(c_in, c_in, K, groups=c_in) and
    # nn.Conv2d(c_in, c_out, 1), stored in kernel-friendly layouts.
    w_dw = jax.random.normal(k1, (K, K, C_in), dtype=jnp.float32) * 0.1
    b_dw = jax.random.normal(k2, (C_in,), dtype=jnp.float32) * 0.1
    w_pw = jax.random.normal(k3, (C_in, C_out), dtype=jnp.float32) * 0.1
    b_pw = jax.random.normal(k4, (C_out,), dtype=jnp.float32) * 0.1

    # Lambda module wrapping the Pallas depthwise-separable conv "function".
    layer = Lambda(functools.partial(
        depthwise_separable_conv2d, w_dw=w_dw, b_dw=b_dw, w_pw=w_pw, b_pw=b_pw,
        padding=padding, stride=stride))

    out = jax.block_until_ready(layer(x))

    ref = _reference(x, w_dw, b_dw, w_pw, b_pw, padding=padding, stride=stride)
    assert out.shape == ref.shape, (out.shape, ref.shape)
    # Tolerance sized for the MXU's reduced-precision f32 matmul path; any
    # tap/shift/halo bug would be O(1e-1) and is still caught.
    assert jnp.allclose(out, ref, atol=1e-2, rtol=1e-2), "mismatch vs reference"

    print("KERNEL_OK")
</pallas_src>

<mosaic_0001>
module attributes {stable_mosaic.version = 11 : i64} {
  func.func @_dwsep_fused_kernel(%arg0: i32, %arg1: i32, %arg2: memref<1x4x1024xf32, #tpu.memory_space<vmem>>, %arg3: memref<1x4x256xf32, #tpu.memory_space<vmem>>, %arg4: memref<9x8x4xf32, #tpu.memory_space<vmem>>, %arg5: memref<8x1xf32, #tpu.memory_space<vmem>>, %arg6: memref<1x8x1024xf32, #tpu.memory_space<vmem>>) attributes {dimension_semantics = [#tpu.dimension_semantics<parallel>, #tpu.dimension_semantics<parallel>], iteration_bounds = array<i64: 2, 2>, scalar_prefetch = 0 : i64, scratch_operands = 0 : i64, tpu.core_type = #tpu.core_type<tc>, window_params = [{transform_indices = @transform_0, window_bounds = array<i64: 1, 4, 1024>}, {transform_indices = @transform_1, window_bounds = array<i64: 1, 4, 256>}, {pipeline_mode = #tpu.pipeline_mode<synchronous>, transform_indices = @transform_2, window_bounds = array<i64: 9, 8, 4>}, {pipeline_mode = #tpu.pipeline_mode<synchronous>, transform_indices = @transform_3, window_bounds = array<i64: 8, 1>}, {transform_indices = @transform_4, window_bounds = array<i64: 1, 8, 1024>}]} {
    %c0 = arith.constant 0 : index
    %c0_0 = arith.constant 0 : index
    %c0_1 = arith.constant 0 : index
    %0 = vector.load %arg2[%c0, %c0_0, %c0_1] : memref<1x4x1024xf32, #tpu.memory_space<vmem>>, vector<1x4x1024xf32>
    %1 = vector.shape_cast %0 : vector<1x4x1024xf32> to vector<4x1024xf32>
    %c0_2 = arith.constant 0 : index
    %c0_3 = arith.constant 0 : index
    %c0_4 = arith.constant 0 : index
    %2 = vector.load %arg3[%c0_2, %c0_3, %c0_4] : memref<1x4x256xf32, #tpu.memory_space<vmem>>, vector<1x4x256xf32>
    %3 = vector.shape_cast %2 : vector<1x4x256xf32> to vector<4x256xf32>
    %4 = tpu.concatenate %1, %3 in 1 : vector<4x1024xf32>, vector<4x256xf32> -> vector<4x1280xf32>
    %cst = arith.constant 0.000000e+00 : f32
    %5 = vector.broadcast %cst : f32 to vector<8x1024xf32>
    %6 = vector.extract_strided_slice %4 {offsets = [0, 0], sizes = [4, 1024], strides = [1, 1]} : vector<4x1280xf32> to vector<4x1024xf32>
    %c0_5 = arith.constant 0 : index
    %c0_6 = arith.constant 0 : index
    %c0_7 = arith.constant 0 : index
    %7 = vector.load %arg4[%c0_5, %c0_6, %c0_7] : memref<9x8x4xf32, #tpu.memory_space<vmem>>, vector<1x8x4xf32>
    %8 = vector.shape_cast %7 : vector<1x8x4xf32> to vector<8x4xf32>
    %cst_8 = arith.constant dense<0.000000e+00> : vector<8x1024xf32>
    %9 = tpu.matmul %8, %6, %cst_8 {dimension_numbers = #tpu.dot_dimension_numbers<[1], [0], [0], [1], [0, 0, 1, 1], [], []>} : vector<8x4xf32>, vector<4x1024xf32>, vector<8x1024xf32> -> vector<8x1024xf32>
    %10 = arith.addf %5, %9 : vector<8x1024xf32>
    %11 = vector.extract_strided_slice %4 {offsets = [0, 128], sizes = [4, 1024], strides = [1, 1]} : vector<4x1280xf32> to vector<4x1024xf32>
    %c3 = arith.constant 3 : index
    %c0_9 = arith.constant 0 : index
    %c0_10 = arith.constant 0 : index
    %12 = vector.load %arg4[%c3, %c0_9, %c0_10] : memref<9x8x4xf32, #tpu.memory_space<vmem>>, vector<1x8x4xf32>
    %13 = vector.shape_cast %12 : vector<1x8x4xf32> to vector<8x4xf32>
    %cst_11 = arith.constant dense<0.000000e+00> : vector<8x1024xf32>
    %14 = tpu.matmul %13, %11, %cst_11 {dimension_numbers = #tpu.dot_dimension_numbers<[1], [0], [0], [1], [0, 0, 1, 1], [], []>} : vector<8x4xf32>, vector<4x1024xf32>, vector<8x1024xf32> -> vector<8x1024xf32>
    %15 = arith.addf %10, %14 : vector<8x1024xf32>
    %16 = vector.extract_strided_slice %4 {offsets = [0, 256], sizes = [4, 1024], strides = [1, 1]} : vector<4x1280xf32> to vector<4x1024xf32>
    %c6 = arith.constant 6 : index
    %c0_12 = arith.constant 0 : index
    %c0_13 = arith.constant 0 : index
    %17 = vector.load %arg4[%c6, %c0_12, %c0_13] : memref<9x8x4xf32, #tpu.memory_space<vmem>>, vector<1x8x4xf32>
    %18 = vector.shape_cast %17 : vector<1x8x4xf32> to vector<8x4xf32>
    %cst_14 = arith.constant dense<0.000000e+00> : vector<8x1024xf32>
    %19 = tpu.matmul %18, %16, %cst_14 {dimension_numbers = #tpu.dot_dimension_numbers<[1], [0], [0], [1], [0, 0, 1, 1], [], []>} : vector<8x4xf32>, vector<4x1024xf32>, vector<8x1024xf32> -> vector<8x1024xf32>
    %20 = arith.addf %15, %19 : vector<8x1024xf32>
    %c1279_i32 = arith.constant 1279 : i32
    %21 = tpu.dynamic_rotate %4 by %c1279_i32 dim 1 : vector<4x1280xf32>, i32 -> vector<4x1280xf32>
    %22 = vector.extract_strided_slice %21 {offsets = [0, 0], sizes = [4, 1024], strides = [1, 1]} : vector<4x1280xf32> to vector<4x1024xf32>
    %c1 = arith.constant 1 : index
    %c0_15 = arith.constant 0 : index
    %c0_16 = arith.constant 0 : index
    %23 = vector.load %arg4[%c1, %c0_15, %c0_16] : memref<9x8x4xf32, #tpu.memory_space<vmem>>, vector<1x8x4xf32>
    %24 = vector.shape_cast %23 : vector<1x8x4xf32> to vector<8x4xf32>
    %cst_17 = arith.constant dense<0.000000e+00> : vector<8x1024xf32>
    %25 = tpu.matmul %24, %22, %cst_17 {dimension_numbers = #tpu.dot_dimension_numbers<[1], [0], [0], [1], [0, 0, 1, 1], [], []>} : vector<8x4xf32>, vector<4x1024xf32>, vector<8x1024xf32> -> vector<8x1024xf32>
    %26 = arith.addf %20, %25 : vector<8x1024xf32>
    %27 = vector.extract_strided_slice %21 {offsets = [0, 128], sizes = [4, 1024], strides = [1, 1]} : vector<4x1280xf32> to vector<4x1024xf32>
    %c4 = arith.constant 4 : index
    %c0_18 = arith.constant 0 : index
    %c0_19 = arith.constant 0 : index
    %28 = vector.load %arg4[%c4, %c0_18, %c0_19] : memref<9x8x4xf32, #tpu.memory_space<vmem>>, vector<1x8x4xf32>
    %29 = vector.shape_cast %28 : vector<1x8x4xf32> to vector<8x4xf32>
    %cst_20 = arith.constant dense<0.000000e+00> : vector<8x1024xf32>
    %30 = tpu.matmul %29, %27, %cst_20 {dimension_numbers = #tpu.dot_dimension_numbers<[1], [0], [0], [1], [0, 0, 1, 1], [], []>} : vector<8x4xf32>, vector<4x1024xf32>, vector<8x1024xf32> -> vector<8x1024xf32>
    %31 = arith.addf %26, %30 : vector<8x1024xf32>
    %32 = vector.extract_strided_slice %21 {offsets = [0, 256], sizes = [4, 1024], strides = [1, 1]} : vector<4x1280xf32> to vector<4x1024xf32>
    %c7 = arith.constant 7 : index
    %c0_21 = arith.constant 0 : index
    %c0_22 = arith.constant 0 : index
    %33 = vector.load %arg4[%c7, %c0_21, %c0_22] : memref<9x8x4xf32, #tpu.memory_space<vmem>>, vector<1x8x4xf32>
    %34 = vector.shape_cast %33 : vector<1x8x4xf32> to vector<8x4xf32>
    %cst_23 = arith.constant dense<0.000000e+00> : vector<8x1024xf32>
    %35 = tpu.matmul %34, %32, %cst_23 {dimension_numbers = #tpu.dot_dimension_numbers<[1], [0], [0], [1], [0, 0, 1, 1], [], []>} : vector<8x4xf32>, vector<4x1024xf32>, vector<8x1024xf32> -> vector<8x1024xf32>
    %36 = arith.addf %31, %35 : vector<8x1024xf32>
    %c1278_i32 = arith.constant 1278 : i32
    %37 = tpu.dynamic_rotate %4 by %c1278_i32 dim 1 : vector<4x1280xf32>, i32 -> vector<4x1280xf32>
    %38 = vector.extract_strided_slice %37 {offsets = [0, 0], sizes = [4, 1024], strides = [1, 1]} : vector<4x1280xf32> to vector<4x1024xf32>
    %c2 = arith.constant 2 : index
    %c0_24 = arith.constant 0 : index
    %c0_25 = arith.constant 0 : index
    %39 = vector.load %arg4[%c2, %c0_24, %c0_25] : memref<9x8x4xf32, #tpu.memory_space<vmem>>, vector<1x8x4xf32>
    %40 = vector.shape_cast %39 : vector<1x8x4xf32> to vector<8x4xf32>
    %cst_26 = arith.constant dense<0.000000e+00> : vector<8x1024xf32>
    %41 = tpu.matmul %40, %38, %cst_26 {dimension_numbers = #tpu.dot_dimension_numbers<[1], [0], [0], [1], [0, 0, 1, 1], [], []>} : vector<8x4xf32>, vector<4x1024xf32>, vector<8x1024xf32> -> vector<8x1024xf32>
    %42 = arith.addf %36, %41 : vector<8x1024xf32>
    %43 = vector.extract_strided_slice %37 {offsets = [0, 128], sizes = [4, 1024], strides = [1, 1]} : vector<4x1280xf32> to vector<4x1024xf32>
    %c5 = arith.constant 5 : index
    %c0_27 = arith.constant 0 : index
    %c0_28 = arith.constant 0 : index
    %44 = vector.load %arg4[%c5, %c0_27, %c0_28] : memref<9x8x4xf32, #tpu.memory_space<vmem>>, vector<1x8x4xf32>
    %45 = vector.shape_cast %44 : vector<1x8x4xf32> to vector<8x4xf32>
    %cst_29 = arith.constant dense<0.000000e+00> : vector<8x1024xf32>
    %46 = tpu.matmul %45, %43, %cst_29 {dimension_numbers = #tpu.dot_dimension_numbers<[1], [0], [0], [1], [0, 0, 1, 1], [], []>} : vector<8x4xf32>, vector<4x1024xf32>, vector<8x1024xf32> -> vector<8x1024xf32>
    %47 = arith.addf %42, %46 : vector<8x1024xf32>
    %48 = vector.extract_strided_slice %37 {offsets = [0, 256], sizes = [4, 1024], strides = [1, 1]} : vector<4x1280xf32> to vector<4x1024xf32>
    %c8 = arith.constant 8 : index
    %c0_30 = arith.constant 0 : index
    %c0_31 = arith.constant 0 : index
    %49 = vector.load %arg4[%c8, %c0_30, %c0_31] : memref<9x8x4xf32, #tpu.memory_space<vmem>>, vector<1x8x4xf32>
    %50 = vector.shape_cast %49 : vector<1x8x4xf32> to vector<8x4xf32>
    %cst_32 = arith.constant dense<0.000000e+00> : vector<8x1024xf32>
    %51 = tpu.matmul %50, %48, %cst_32 {dimension_numbers = #tpu.dot_dimension_numbers<[1], [0], [0], [1], [0, 0, 1, 1], [], []>} : vector<8x4xf32>, vector<4x1024xf32>, vector<8x1024xf32> -> vector<8x1024xf32>
    %52 = arith.addf %47, %51 : vector<8x1024xf32>
    %c0_33 = arith.constant 0 : index
    %c0_34 = arith.constant 0 : index
    %53 = vector.load %arg5[%c0_33, %c0_34] : memref<8x1xf32, #tpu.memory_space<vmem>>, vector<8x1xf32>
    %54 = vector.broadcast %53 : vector<8x1xf32> to vector<8x1024xf32>
    %55 = arith.addf %52, %54 : vector<8x1024xf32>
    %c0_35 = arith.constant 0 : index
    %c0_36 = arith.constant 0 : index
    %c0_37 = arith.constant 0 : index
    %56 = vector.load %arg6[%c0_35, %c0_36, %c0_37] : memref<1x8x1024xf32, #tpu.memory_space<vmem>>, vector<1x8x1024xf32>
    %57 = vector.shape_cast %56 : vector<1x8x1024xf32> to vector<8x1024xf32>
    %58 = vector.shape_cast %55 : vector<8x1024xf32> to vector<1x8x1024xf32>
    tpu.vector_store %arg6[%c0_35, %c0_36, %c0_37], %58 {strides = array<i32>} : memref<1x8x1024xf32, #tpu.memory_space<vmem>>, vector<1x8x1024xf32>,
    return
  }
  func.func @transform_0(%arg0: i32, %arg1: i32) -> (i32, i32, i32) {
    %c0_i32 = arith.constant 0 : i32
    %c0_i32_0 = arith.constant 0 : i32
    return %arg0, %c0_i32, %arg1 : i32, i32, i32
  }
  func.func @transform_1(%arg0: i32, %arg1: i32) -> (i32, i32, i32) {
    %c1_i32 = arith.constant 1 : i32
    %0 = arith.addi %arg1, %c1_i32 : i32
    %c4_i32 = arith.constant 4 : i32
    %1 = arith.muli %0, %c4_i32 : i32
    %c0_i32 = arith.constant 0 : i32
    %c0_i32_0 = arith.constant 0 : i32
    return %arg0, %c0_i32, %1 : i32, i32, i32
  }
  func.func @transform_2(%arg0: i32, %arg1: i32) -> (i32, i32, i32) {
    %c0_i32 = arith.constant 0 : i32
    %c0_i32_0 = arith.constant 0 : i32
    %c0_i32_1 = arith.constant 0 : i32
    %c0_i32_2 = arith.constant 0 : i32
    return %c0_i32, %c0_i32_0, %c0_i32_1 : i32, i32, i32
  }
  func.func @transform_3(%arg0: i32, %arg1: i32) -> (i32, i32) {
    %c0_i32 = arith.constant 0 : i32
    %c0_i32_0 = arith.constant 0 : i32
    %c0_i32_1 = arith.constant 0 : i32
    return %c0_i32, %c0_i32_0 : i32, i32
  }
  func.func @transform_4(%arg0: i32, %arg1: i32) -> (i32, i32, i32) {
    %c0_i32 = arith.constant 0 : i32
    %c0_i32_0 = arith.constant 0 : i32
    return %arg0, %c0_i32, %arg1 : i32, i32, i32
  }
}

</mosaic_0001>

<bundles_post_ra>
// kernel: tpu_custom_call.1
= control target key start
LH: loop header
LB: loop body
LE: loop exit
PB: predicated region body
PF: predicated region fallthrough
CT: control target
= control target key end

     0   :  { %s4510_s0 = inlined_call_operand.hbm [shape: f32[2,4,2304], index: 0, kind: input, shape index: {}]   ;;  %s4511_s1 = inlined_call_operand.hbm [shape: f32[2,4,2304], index: 1, kind: input, shape index: {}]   ;;  %s4512_s2 = inlined_call_operand.hbm [shape: f32[9,8,4], index: 2, kind: input, shape index: {}]   ;;  %s4513_s3 = inlined_call_operand.hbm [shape: f32[8,1], index: 3, kind: input, shape index: {}]   ;;  %s4514_s4 = inlined_call_operand.hbm [shape: f32[2,8,2048], index: 4, kind: output, shape index: {}]  }
   0x1   :  { %4530 = sst [smem:[#allocation26_spill]] %s4512_s2 }
   0x2   :  { %4531 = sst [smem:[#allocation27_spill]] %s4513_s3 }
   0x3   :  { %4532 = sst [smem:[#allocation28_spill]] %s4514_s4 }
   0x4   :  { %9 = vsyncpa [#allocation3], 0 }
   0x5   :  { %11 = vsyncpa [#allocation3 + $0x1], 0 }
   0x6   :  { %12 = vsyncpa [#allocation6], 0 }
   0x7   :  { %14 = vsyncpa [#allocation6 + $0x1], 0 }
   0x8   :  { %15 = vsyncpa [#allocation9], 0 }
   0x9   :  { %16 = vsyncpa [#allocation4], 0 }
   0xa   :  { %18 = vsyncpa [#allocation4 + $0x1], 0  ;;  %s3941_s15 = smov 0   ;;  %s3943_s16 = smov 0  }
   0xb   :  { %s3945_s17 = smov 0   ;;  %s3947_s18 = smov 0  }
   0xc   :  { %s3949_s19 = smov 0   ;;  %s3951_s20 = smov 0  }
   0xd   :  { %s3953_s21 = smov 0   ;;  %s3955_s22 = smov 0  }
   0xe   :  { %s3957_s23 = smov 0   ;;  %s3959_s24 = smov 0  }
   0xf   :  { %s3961_s25 = smov 0  }
  0x10 LB: > { %4533 = sst [smem:[#allocation16_spill]] %s3875_s18  ;;  %s3997_s26 = sadd.s32 4294967295, %s3903_s25   ;;  %s3903_s25 = sphi %s3961_s25, %s24_s25   ;;  %s3899_s24 = sphi %s3959_s24, %s4586_s24   ;;  %s3895_s23 = sphi %s3957_s23, %s4585_s23   ;;  %s3891_s22 = sphi %s3955_s22, %s4584_s22   ;;  %s3887_s21 = sphi %s3953_s21, %s4583_s21   ;;  %s3883_s20 = sphi %s3951_s20, %s4582_s20   ;;  %s3879_s19 = sphi %s3949_s19, %s4581_s19   ;;  %s3875_s18 = sphi %s3947_s18, %s4580_s18   ;;  %s3871_s17 = sphi %s3945_s17, %s4579_s17   ;;  %s3867_s16 = sphi %s3943_s16, %s4578_s16   ;;  %s3863_s15 = sphi %s3941_s15, %s4577_s15  }
  0x11   : > { %4534 = sst [smem:[#allocation17_spill]] %s3883_s20  ;;  %s33_s28 = sadd.s32 1, %s3895_s23 }
  0x12   : > { %4535 = sst [smem:[#allocation18_spill]] %s3887_s21  ;;  %s36_s29 = sadd.s32 1, %s3899_s24 }
  0x13   : > { %4536 = sst [smem:[#allocation19_spill]] %s3891_s22  ;;  %p34_p0 = scmp.ge.s32.totalorder %s33_s28, 2 }
  0x14   : > { %s45_s30 = sadd.s32 1, %s3883_s20  ;;  %p52_p1 = scmp.ne.s32.totalorder %s3883_s20, %s3879_s19 }
  0x15   : > { %p53_p2 = scmp.eq.s32.totalorder %s3903_s25, 0  ;;  %s4588_s28 = smov (%p34_p0, %s33_s28), 0 }
  0x16   : > { %4537 = sst [smem:[#allocation20_spill]] %s4588_s28  ;;  %s4590_s29 = smov (!%p34_p0, %s36_s29), %s3899_s24 }
  0x17   : > { %s41_s5 = ssub.s32 %s3895_s23, %s4588_s28  ;;  %p4016_p3 = por %p53_p2, %p52_p1 }
  0x18   : > { %p38_p4 = scmp.ge.s32.totalorder %s4590_s29, 2  ;;  %p4516_p5 = scmp.ne.s32.totalorder %s3879_s19, %s3875_s18 }
  0x19   : > { %s4538_s6 = scalar_select %p4016_p3, 1, 0 }
  0x1a   : > { %p4521_p6 = scmp.eq.s32.totalorder %s3997_s26, 0  ;;  %s3454_s7 = sshll.u32 %s3895_s23, 2 }
  0x1b   : > { %s4592_s29 = smov (%p38_p4, %s4590_s29), 0  ;;  %s3455_s9 = sadd.s32 4, %s3454_s7 }
  0x1c   : > { %4539 = sst [smem:[#allocation21_spill]] %s4592_s29  ;;  %p4031_p7 = por %p4521_p6, %p4516_p5 }
  0x1d   : > { %s40_s10 = ssub.s32 %s3899_s24, %s4592_s29  ;;  %s3456_s11 = sshll.u32 %s4588_s28, 2 }
  0x1e   : > { %s4540_s8 = scalar_select %p4031_p7, 1, 0 }
  0x1f   : > { %s42_s12 = sor.u32 %s41_s5, %s40_s10  ;;  %s3457_s13 = sadd.s32 4, %s3456_s11 }
  0x20   : > { %p43_p8 = scmp.eq.s32.totalorder %s42_s12, 0  ;;  %s73_s14 = ssub.s32 %s3455_s9, %s3457_s13 }
  0x21   : > { %s74_s27 = sor.u32 %s73_s14, %s40_s10  ;;  %s77_s4 = sadd.s32 1, %s3871_s17 }
  0x22   : > { %s4040_s22 = scalar_select %p43_p8, %s3883_s20, %s45_s30  }
  0x23   : > { %p75_p9 = scmp.eq.s32.totalorder %s74_s27, 0  ;;  %p84_p10 = scmp.ne.s32.totalorder %s3871_s17, %s3867_s16 }
  0x24   : > { %4541 = sst [smem:[#allocation22_spill]] %s4040_s22  ;;  %p90_p11 = scmp.ne.s32.totalorder %s3867_s16, %s3863_s15 }
  0x25   : > { %p158_p12 = scmp.eq.s32.totalorder %s3997_s26, 3  ;;  %p4052_p13 = por %p84_p10, %p53_p2 }
  0x26   : > { %s4048_s7 = scalar_select %p75_p9, %s3871_s17, %s77_s4  }
  0x27   : > { %s4543_s5 = scalar_select %p4052_p13, 1, 0 }
  0x28   : > { %4542 = sst [smem:[#allocation23_spill]] %s4048_s7  ;;  %p4058_p0 = por %p90_p11, %p4521_p6 }
  0x29   : > { %p4065_p4 = por %p158_p12, %p52_p1  ;;  %s4547_s27 = sadd.s32 4294967294, %s3903_s25  }
  0x2a   : > { %s4544_s11 = scalar_select %p4058_p0, 1, 0 }
  0x2b   : > { %s4545_s30 = scalar_select %p4065_p4, 1, 0 }
  0x2c   : > { %p164_p8 = scmp.eq.s32.totalorder %s4547_s27, 3  ;;  %p3320_p5 = scmp.ge.s32.totalorder %s3903_s25, 1 }
  0x2d   : > { %4546 = sst [smem:[#allocation24_spill]] %s4545_s30  ;;  %p171_p9 = scmp.lt.s32.totalorder %s3903_s25, 5 }
  0x2e   : > { %p4548_p7 = scmp.ne.s32.totalorder %s3879_s19, %s3875_s18  ;;  %s3905_s9 = smov [#allocation7]  }
  0x2f   : > { %p4080_p2 = pnand %p3320_p5, %p171_p9  ;;  %s183_s10 = sshll.u32 %s3905_s9, 4  ;;  %s184_s10 = int_to_ptr.vmem [resolvable:$true] %s183_s10 }
  0x30   : > { %p4076_p3 = por %p164_p8, %p4548_p7  ;;  %s3906_s13 = smov [#allocation8]  }
  0x31   : > { %s4551_s15 = scalar_select %p4080_p2, 1, 0 }
  0x32   : > { %s4549_s4 = scalar_select %p4076_p3, 1, 0 }
  0x33   : > { %p3536_p1 = pneg %p4080_p2  ;;  %s197_s14 = sshll.u32 %s3906_s13, 4  ;;  %s4092_s14 = int_to_ptr.vmem [resolvable:$true] %s197_s14 }
  0x34   : > { %4550 = sst [smem:[#allocation25_spill]] %s4549_s4  ;;  %s4553_s2 = sld [smem:[#allocation26_spill]] }
  0x35   : > { %p4088_p10 = pnand %p3536_p1, %p4521_p6 }
  0x37   : > { %p3656_p7 = pneg %p4088_p10 }
  0x3a   : > { %s3654_s28 = scalar_lea.hbm %s4553_s2, 1152 }
  0x3b   : > { %p3655_p5 = scmp.ne.s32.totalorder %s4553_s2, %s3654_s28  ;;  %p3661_p8 = scmp.lt.u32.totalorder %s3654_s28, %s4553_s2 }
  0x3d   : > { %p3657_p11 = pnand %p3656_p7, %p3655_p5 }
  0x3f   : > { %p3658_p12 = pneg %p3657_p11 }
  0x41   : > { %p3663_p9 = pnand %p3661_p8, %p3658_p12 }
  0x43   : > { %3666 = shalt.err (!%p3663_p9)
}
  0x44   : > { %s3667_s13 = scalar_lea.vmem %s184_s10, 1152  ;;  %p3675_p4 = scmp.lt.s32.totalorder %s184_s10, %s184_s10 }
  0x45   : > { %p3668_p1 = scmp.ne.s32.totalorder %s184_s10, %s3667_s13  ;;  %p3676_p0 = scmp.lt.s32.totalorder %s3667_s13, %s3667_s13 }
  0x47   : > { %p3670_p6 = pnand %p3668_p1, %p3656_p7  ;;  %p3677_p2 = por %p3676_p0, %p3675_p4 }
  0x49   : > { %p3671_p3 = pneg %p3670_p6 }
  0x4b   : > { %p3678_p13 = pnand %p3677_p2, %p3671_p3 }
  0x4d   : > { %3681 = shalt.err (!%p3678_p13)
}
  0x4e   : > { %s3907_s22 = smov 128   ;;  %s3908_s29 = smov 8  }
  0x4f   : > { %3539 = dma.hbm_to_vmem [thread:$0]  (!%p4088_p10), %s4553_s2, 1152, %s184_s10, [#allocation6], %s3907_s22, %s3907_s22, %s3908_s29  }
  0x50   : > { %s4554_s3 = sld [smem:[#allocation27_spill]] }
  0x56   : > { %s3682_s9 = scalar_lea.hbm %s4554_s3, 128 }
  0x57   : > { %p3683_p6 = scmp.ne.s32.totalorder %s4554_s3, %s3682_s9  ;;  %p3689_p0 = scmp.lt.u32.totalorder %s3682_s9, %s4554_s3 }
  0x59   : > { %p3685_p3 = pnand %p3683_p6, %p3656_p7 }
  0x5b   : > { %p3686_p13 = pneg %p3685_p3 }
  0x5d   : > { %p3691_p4 = pnand %p3689_p0, %p3686_p13 }
  0x5f   : > { %3694 = shalt.err (!%p3691_p4)
}
  0x60   : > { %s3695_s10 = scalar_lea.vmem %s4092_s14, 128  ;;  %p3703_p12 = scmp.lt.s32.totalorder %s4092_s14, %s4092_s14 }
  0x61   : > { %p3696_p2 = scmp.ne.s32.totalorder %s4092_s14, %s3695_s10  ;;  %p3704_p8 = scmp.lt.s32.totalorder %s3695_s10, %s3695_s10 }
  0x63   : > { %p3698_p5 = pnand %p3696_p2, %p3656_p7  ;;  %p3705_p9 = por %p3704_p8, %p3703_p12 }
  0x65   : > { %p3699_p11 = pneg %p3698_p5 }
  0x67   : > { %p3706_p1 = pnand %p3705_p9, %p3699_p11 }
  0x69   : > { %3709 = shalt.err (!%p3706_p1)
}
  0x6a   : > { %3542 = dma.hbm_to_vmem [thread:$0]  (!%p4088_p10), %s4554_s3, 128, %s4092_s14, [#allocation9]  }
  0x6b   : > { %p3323_p6 = scmp.ge.s32.totalorder %s3903_s25, 4 }
  0x6c   : > { %p4555_p3 = scmp.ne.s32.totalorder (!%p3323_p6), %s4538_s6, 0 }
  0x6d   : > { %204 = sbr.rel (%p3323_p6) target bundleno = 174 (0xae), region = 24 }
  0x74   : > { %207 = sbr.rel (!%p4555_p3) target bundleno = 145 (0x91), region = 28  ;;  %s208_s30 = sand.u32 (%p4555_p3), 1, %s3883_s20  }
  0x75   : > { %s3325_s22 = sshll.u32 (%p4555_p3), %s3895_s23, 3  ;;  %s3324_s29 = sshll.u32 (%p4555_p3), %s208_s30, 5 }
  0x76   : > { %s4146_s28 = scalar_lea.sflag (%p4555_p3), [#allocation3], %s208_s30  ;;  %s212_s12 = scalar_lea.vmem (%p4555_p3), [#allocation2], %s3324_s29 }
  0x77   : > { %s3522_s7 = smul.u32 (%p4555_p3), 18, %s3899_s24  ;;  %s228_s4 = sshll.u32 (%p4555_p3), %s212_s12, 4  ;;  %s229_s4 = int_to_ptr.vmem [resolvable:$true] %s228_s4 }
  0x78   : > { %s3714_s2 = scalar_lea.hbm (%p4555_p3), %s4510_s0, 2304 }
  0x79   : > { %s223_s27 = sadd.s32 (%p4555_p3), %s3522_s7, %s3325_s22 }
  0x7a   : > { %s3328_s14 = sshll.u32 (%p4555_p3), %s223_s27, 6 }
  0x7b   : > { %s225_s10 = scalar_lea.hbm %s4510_s0, %s3328_s14 }
  0x7c   : > { %s3710_s6 = scalar_lea.hbm %s225_s10, 512  ;;  %p3715_p7 = scmp.lt.u32.totalorder %s225_s10, %s4510_s0 }
  0x7d   : > { %p3711_p10 = scmp.ne.s32.totalorder %s225_s10, %s3710_s6  ;;  %p3716_p13 = scmp.lt.u32.totalorder %s3714_s2, %s3710_s6 }
  0x7e   : > { %p3718_p4 = scmp.lt.u32.totalorder %s3710_s6, %s225_s10 }
  0x7f   : > { %p3717_p0 = por %p3716_p13, %p3715_p7 }
  0x81   : > { %p3719_p2 = por %p3718_p4, %p3717_p0 }
  0x83   : > { %p3720_p5 = pnand %p3719_p2, %p3711_p10 }
  0x85   : > { %3723 = shalt.err (!%p3720_p5)
}
  0x86   : > { %s3724_s30 = scalar_lea.vmem %s229_s4, 512  ;;  %s3909_s22 = smov [#allocation2]  }
  0x87   : > { %p3725_p11 = scmp.ne.s32.totalorder %s229_s4, %s3724_s30  ;;  %s3728_s29 = sshll.u32 %s3909_s22, 4  ;;  %s3729_s29 = int_to_ptr.vmem [resolvable:$false] %s3728_s29 }
  0x88   : > { %s3730_s12 = scalar_lea.vmem %s3729_s29, 1024  ;;  %p3731_p12 = scmp.lt.s32.totalorder %s229_s4, %s3729_s29 }
  0x89   : > { %p3732_p8 = scmp.lt.s32.totalorder %s3730_s12, %s3724_s30 }
  0x8b   : > { %p3733_p9 = por %p3732_p8, %p3731_p12 }
  0x8d   : > { %p3734_p1 = pnand %p3733_p9, %p3725_p11 }
  0x8f   : > { %3737 = shalt.err (!%p3734_p1)
}
  0x90   : > { %231 = dma.hbm_to_vmem [thread:$0]  %s225_s10, 512, %s229_s4, %s4146_s28  }
  0x91 PF: > { %s237_s2 = sand.u32 1, %s3871_s17   ;;  %s235_s3 = sand.u32 1, %s3903_s25  }
  0x92   : > { %s3331_s20 = sshll.u32 %s237_s2, 3  ;;  %s3332_s7 = sshll.u32 %s3895_s23, 3 }
  0x93   : > { %s3223_s27 = smul.u32 18, %s3899_s24  ;;  %s239_s14 = scalar_lea.vmem [#allocation5], %s3331_s20 }
  0x94   : > { %s251_s9 = sshll.u32 %s239_s14, 4  ;;  %s236_s10 = scalar_lea.sflag [#allocation6], %s235_s3  ;;  %s4163_s9 = int_to_ptr.vmem [resolvable:$true] %s251_s9 }
  0x95   : > { %s3224_s13 = sadd.s32 %s3332_s7, %s3223_s27  ;;  %p4556_p3 = scmp.ne.s32.totalorder %s4543_s5, 0 }
  0x96   : > { %s3333_s6 = sshll.u32 %s3224_s13, 6  ;;  %s3742_s12 = scalar_lea.hbm %s4511_s1, 2304 }
  0x97   : > { %s3226_s28 = scalar_lea.hbm %s4511_s1, %s3333_s6 }
  0x98   : > { %s3227_s4 = scalar_lea.hbm %s3226_s28, 512  ;;  %s3766_s30 = scalar_lea.hbm %s3226_s28, 640 }
  0x99   : > { %p3739_p6 = scmp.ne.s32.totalorder %s3227_s4, %s3766_s30  ;;  %p3743_p13 = scmp.lt.u32.totalorder %s3227_s4, %s4511_s1 }
  0x9a   : > { %p3744_p0 = scmp.lt.u32.totalorder %s3742_s12, %s3766_s30  ;;  %p3746_p2 = scmp.lt.u32.totalorder %s3766_s30, %s3227_s4 }
  0x9b   : > { %p3740_p10 = pnand %p3739_p6, %p4556_p3 }
  0x9c   : > { %p3745_p4 = por %p3744_p0, %p3743_p13 }
  0x9d   : > { %p3741_p7 = pneg %p3740_p10 }
  0x9e   : > { %p3747_p5 = por %p3746_p2, %p3745_p4 }
  0xa0   : > { %p3748_p11 = pnand %p3747_p5, %p3741_p7 }
  0xa2   : > { %3751 = shalt.err (!%p3748_p11)
}
  0xa3   : > { %s3752_s3 = scalar_lea.vmem %s4163_s9, 128  ;;  %s3910_s7 = smov [#allocation5]  }
  0xa4   : > { %p3753_p12 = scmp.ne.s32.totalorder %s4163_s9, %s3752_s3  ;;  %s3756_s27 = sshll.u32 %s3910_s7, 4  ;;  %s3757_s27 = int_to_ptr.vmem [resolvable:$false] %s3756_s27 }
  0xa5   : > { %s3758_s14 = scalar_lea.vmem %s3757_s27, 256  ;;  %p3759_p1 = scmp.lt.s32.totalorder %s4163_s9, %s3757_s27 }
  0xa6   : > { %p3754_p8 = pnand %p3753_p12, %p4556_p3  ;;  %p3760_p6 = scmp.lt.s32.totalorder %s3758_s14, %s3752_s3 }
  0xa8   : > { %p3755_p9 = pneg %p3754_p8  ;;  %p3761_p10 = por %p3760_p6, %p3759_p1 }
  0xaa   : > { %p3762_p13 = pnand %p3761_p10, %p3755_p9 }
  0xac   : > { %3765 = shalt.err (!%p3762_p13)
}
  0xad   : > { %3527 = dma.hbm_to_vmem [thread:$0]  (%p4556_p3), %s3227_s4, 128, %s4163_s9, %s236_s10  }
  0xae PF: > { %p4557_p7 = scmp.ne.s32.totalorder %s4551_s15, 0 }
  0xaf   : > { %s4187_s13 = sand.u32 (!%p4557_p7), 1, %s3879_s19   ;;  %p4558_p0 = scmp.ne.s32.totalorder (!%p4557_p7), %s4540_s8, 0 }
  0xb0   : > { %260 = sbr.rel (%p4557_p7) target bundleno = 601 (0x259), region = 36  ;;  %s3335_s6 = sshll.u32 (!%p4557_p7), %s4187_s13, 5 }
  0xb1   : > { %s263_s18 = scalar_lea.sflag (!%p4557_p7), [#allocation3], %s4187_s13  ;;  %s266_s21 = scalar_lea.vmem (!%p4557_p7), [#allocation2], %s3335_s6 }
  0xb7   : > { %3840 = dma.done.wait (%p4558_p0), %s263_s18, 512  }
  0xb8   : > { %3842 = vsyncadd (%p4558_p0), %s263_s18, 4294966784  ;;  %s271_s5 = sand.u32 1, %s3997_s26   ;;  %s273_s15 = sand.u32 1, %s3867_s16  }
  0xb9   : > { %s4197_s9 = sshll.u32 %s273_s15, 3  ;;  %s272_s28 = scalar_lea.sflag [#allocation6], %s271_s5 }
  0xba   : > { %s275_s4 = scalar_lea.vmem [#allocation5], %s4197_s9  ;;  %p4559_p3 = scmp.ne.s32.totalorder %s4544_s11, 0 }
  0xbc   : > { %3844 = dma.done.wait (%p4559_p3), %s272_s28, 128  }
  0xbd   : > { %3846 = vsyncadd (%p4559_p3), %s272_s28, 4294967168  ;;  %p4560_p4 = scmp.eq.s32.totalorder %s3997_s26, 0 }
  0xbf   : > { %3848 = dma.done.wait (%p4560_p4), [#allocation6], 1152   ;;  %p4561_p2 = pmov %p4560_p4 }
  0xc1   : > { %3850 = vsyncadd (%p4561_p2), [#allocation6], 4294966144  ;;  %p4562_p5 = pmov %p4561_p2 }
  0xc2   : > { %p4563_p11 = pmov %p4561_p2 }
  0xc3   : > { %3852 = dma.done.wait (%p4562_p5), [#allocation9], 128  }
  0xc4   : > { %3854 = vsyncadd (%p4563_p11), [#allocation9], 4294967168  ;;  %v3911_v0 = vmov 0.0   ;;  %vm349_vm0 = vcmask 1043456   ;;  %v4214_v1 = vld [vmem:[%s266_s21 + $0x10] sm:$0xff]  ;;  %v323_v2 = vld [vmem:[%s266_s21 + $0x8] sm:$0xff]  ;;  %v1258_v16 = vlaneseq }
  0xc5   : > { %501 = vmatprep.mubr.f32.mxu1 %v3911_v0  ;;  %430 = vmatprep.mubr.f32.mxu0 %v3911_v0  ;;  %v4216_v3 = vld [vmem:[%s266_s21] sm:$0xff]  ;;  %s3912_s8 = smov 127   ;;  %v332_v4 = vcombine.high %v323_v2, %v323_v2  ;;  %v344_v6 = vld [vmem:[#allocation7 + $0x18] sm:$0xff]  ;;  %vm345_vm1 = vcmask 31744   ;;  %v4223_v7 = vld [vmem:[%s266_s21 + $0x18] sm:$0xff]  ;;  %v333_v8 = vcombine.high %v4214_v1, %v4214_v1  ;;  %s3913_s26 = smov 126  }
  0xc6   : > { %1246 = vrot.lane.b32.xlu1 %v4214_v1, %s3912_s8  ;;  %1242 = vrot.lane.b32.xlu0 %v323_v2, %s3912_s8  ;;  %v331_v5 = vcombine.high %v4216_v3, %v4216_v3  ;;  %v334_v9 = vcombine.high %v4223_v7, %v4223_v7  ;;  %v326_v10 = vld [vmem:[%s275_s4] sm:$0xff]  ;;  %v342_v11 = vld [vmem:[#allocation7] sm:$0xff]  ;;  %v3144_v14 = vld [vmem:[#allocation8] sm:$0xff]  ;;  %v3914_v15 = vmov 0   ;;  %v4299_v17 = vand.u32 127, %v1258_v16  ;;  %s4564_s11 = sld [smem:[#allocation18_spill]] }
  0xc7   : > { %3343 = vmatprep.subr.msk.mxu1 %vm349_vm0, %v4214_v1  ;;  %3340 = vmatprep.subr.msk.mxu0 %vm349_vm0, %v323_v2  ;;  %v340_v12 = vcombine.high %v326_v10, %v326_v10  ;;  %v940_v13 = vld [vmem:[#allocation7 + $0x30] sm:$0xff]  ;;  %v1272_v24 = vld [vmem:[#allocation7 + $0x8] sm:$0xff]  ;;  %v1593_v37 = vld [vmem:[#allocation7 + $0x20] sm:$0xff]  ;;  %s4565_s10 = sld [smem:[#allocation19_spill]]  ;;  %s3339_s30 = sshll.u32 %s4187_s13, 6 }
  0xc8   : > { %3344 = vmatpush1.msk.msra.mxu1 %vm349_vm0, %v332_v4  ;;  %3341 = vmatpush1.msk.msra.mxu0 %vm349_vm0, %v331_v5  ;;  %vm1260_vm2 = vcmp.lt.s32.totalorder %v4299_v17, 127  ;;  %v1893_v43 = vld [vmem:[#allocation7 + $0x38] sm:$0xff]  ;;  %vm2212_vm3 = vcmp.lt.s32.totalorder %v4299_v17, 126  ;;  %v2224_v52 = vld [vmem:[#allocation7 + $0x10] sm:$0xff]  ;;  %v2545_v59 = vld [vmem:[#allocation7 + $0x28] sm:$0xff]  ;;  %s312_s12 = scalar_lea.vmem [#allocation10], %s3339_s30 }
  0xc9   : > { %3345 = vmatmul.mubr.msk.f32.vlgmr.msra.gmra.mrb[0].mxu1 %vm345_vm1, %v344_v6  ;;  %3342 = vmatmul.mubr.msk.f32.vlgmr.msra.gmra.mrb[0].mxu0 %vm345_vm1, %v344_v6  ;;  %v2845_v62 = vld [vmem:[#allocation7 + $0x40] sm:$0xff]  ;;  %s4566_s3 = sld [smem:[#allocation24_spill]]  ;;  %s3183_s7 = sshll.u32 %s312_s12, 4  ;;  %s4449_s7 = int_to_ptr.vmem [resolvable:$true] %s3183_s7 }
  0xca   : > { %1244 = vrot.lane.b32.xlu1 %v332_v4, %s3912_s8  ;;  %1238 = vrot.lane.b32.xlu0 %v4216_v3, %s3912_s8  ;;  %s4567_s6 = sld [smem:[#allocation28_spill]]  ;;  %s3167_s21 = scalar_lea.sflag [#allocation4], %s4187_s13 }
  0xcb   : > { %3349 = vmatprep.subr.msk.mxu1 %vm349_vm0, %v326_v10  ;;  %3346 = vmatprep.subr.msk.mxu0 %vm349_vm0, %v4223_v7  ;;  %s3767_s5 = scalar_lea.vmem %s4449_s7, 1024  ;;  %s3915_s15 = smov [#allocation10]  }
  0xcc   : > { %3350 = vmatpush1.msk.msra.mxu1 %vm349_vm0, %v334_v9  ;;  %643 = vmatprep.mubr.f32.mxu1 %v3911_v0  ;;  %s3449_s22 = sshll.u32 %s4564_s11, 3  ;;  %p3768_p12 = scmp.ne.s32.totalorder %s4449_s7, %s3767_s5 }
  0xcd   : > { %3347 = vmatpush1.msk.msra.mxu0 %vm349_vm0, %v333_v8  ;;  %572 = vmatprep.mubr.f32.mxu0 %v3911_v0  ;;  %s3450_s29 = sshll.u32 %s4565_s10, 4  ;;  %s3771_s9 = sshll.u32 %s3915_s15, 4  ;;  %s3772_s9 = int_to_ptr.vmem [resolvable:$false] %s3771_s9 }
  0xce   : > { %1248 = vrot.lane.b32.xlu1 %v333_v8, %s3912_s8  ;;  %1240 = vrot.lane.b32.xlu0 %v331_v5, %s3912_s8  ;;  %s3179_s2 = sadd.s32 %s3450_s29, %s3449_s22  ;;  %s3773_s28 = scalar_lea.vmem %s3772_s9, 2048 }
  0xcf   : > { %3351 = vmatmul.mubr.msk.f32.vlgmr.msra.gmra.mrb[2].mxu1 %vm345_vm1, %v344_v6  ;;  %3348 = vmatmul.mubr.msk.f32.vlgmr.msra.gmra.mrb[2].mxu0 %vm345_vm1, %v344_v6  ;;  %s3451_s20 = sshll.u32 %s3179_s2, 7  ;;  %p4568_p8 = scmp.ne.s32.totalorder %s4566_s3, 0 }
  0xd0   : > { %3355 = vmatprep.subr.msk.mxu1 %vm349_vm0, %v332_v4  ;;  %3352 = vmatprep.subr.msk.mxu0 %vm349_vm0, %v331_v5  ;;  %s4447_s18 = scalar_lea.hbm %s4567_s6, %s3451_s20  ;;  %p3774_p6 = scmp.lt.s32.totalorder %s4449_s7, %s3772_s9 }
  0xd1   : > { %3356 = vmatpush1.msk.msra.mxu1 %vm349_vm0, %v323_v2  ;;  %790 = vmatprep.mubr.f32.mxu1 %v3911_v0  ;;  %p3769_p9 = pnand %p3768_p12, %p4568_p8  ;;  %p3775_p10 = scmp.lt.s32.totalorder %s3773_s28, %s3767_s5 }
  0xd2   : > { %1252 = vrot.lane.b32.xlu1 %v334_v9, %s3912_s8  ;;  %1250 = vrot.lane.b32.xlu0 %v4223_v7, %s3912_s8 }
  0xd3   : > { %3353 = vmatpush1.msk.msra.mxu0 %vm349_vm0, %v4216_v3  ;;  %719 = vmatprep.mubr.f32.mxu0 %v3911_v0  ;;  %p3770_p1 = pneg %p3769_p9  ;;  %p3776_p13 = por %p3775_p10, %p3774_p6 }
  0xd4   : > { %3357 = vmatmul.mubr.msk.f32.vlgmr.msra.gmra.mrb[0].mxu1 %vm345_vm1, %v342_v11  ;;  %3354 = vmatmul.mubr.msk.f32.vlgmr.msra.gmra.mrb[0].mxu0 %vm345_vm1, %v342_v11 }
  0xd5   : > { %3361 = vmatprep.subr.msk.mxu1 %vm349_vm0, %v334_v9  ;;  %3358 = vmatprep.subr.msk.mxu0 %vm349_vm0, %v333_v8  ;;  %p3777_p7 = pnand %p3776_p13, %p3770_p1 }
  0xd6   : > { %1256 = vrot.lane.b32.xlu1 %v340_v12, %s3912_s8  ;;  %1254 = vrot.lane.b32.xlu0 %v326_v10, %s3912_s8 }
  0xd7   : > { %3362 = vmatpush1.msk.msra.mxu1 %vm349_vm0, %v4223_v7  ;;  %932 = vmatprep.mubr.f32.mxu1 %v3911_v0 }
  0xd8   : > { %3359 = vmatpush1.msk.msra.mxu0 %vm349_vm0, %v4214_v1  ;;  %861 = vmatprep.mubr.f32.mxu0 %v3911_v0 }
  0xd9   : > { %3363 = vmatmul.mubr.msk.f32.vlgmr.msra.gmra.mrb[2].mxu1 %vm345_vm1, %v342_v11  ;;  %3360 = vmatmul.mubr.msk.f32.vlgmr.msra.gmra.mrb[2].mxu0 %vm345_vm1, %v342_v11 }
  0xda   : > { %2196 = vrot.lane.b32.xlu1 %v323_v2, %s3913_s26  ;;  %2194 = vrot.lane.b32.xlu0 %v331_v5, %s3913_s26 }
  0xdb   : > { %3367 = vmatprep.subr.msk.mxu1 %vm349_vm0, %v333_v8  ;;  %3364 = vmatprep.subr.msk.mxu0 %vm349_vm0, %v332_v4 }
  0xdc   : > { %3368 = vmatpush1.msk.msra.mxu1 %vm349_vm0, %v4214_v1  ;;  %1081 = vmatprep.mubr.f32.mxu1 %v3911_v0 }
  0xdd   : > { %3365 = vmatpush1.msk.msra.mxu0 %vm349_vm0, %v323_v2  ;;  %1010 = vmatprep.mubr.f32.mxu0 %v3911_v0 }
  0xde   : > { %2200 = vrot.lane.b32.xlu1 %v4214_v1, %s3913_s26  ;;  %2198 = vrot.lane.b32.xlu0 %v332_v4, %s3913_s26 }
  0xdf   : > { %3369 = vmatmul.mubr.msk.f32.vlgmr.msra.gmra.mrb[0].mxu1 %vm345_vm1, %v940_v13  ;;  %3373 = vmatprep.subr.msk.mxu1 %vm349_vm0, %v340_v12 }
  0xe0   : > { %3366 = vmatmul.mubr.msk.f32.vlgmr.msra.gmra.mrb[0].mxu0 %vm345_vm1, %v940_v13  ;;  %3374 = vmatpush1.msk.msra.mxu1 %vm349_vm0, %v326_v10 }
  0xe1   : > { %3370 = vmatprep.subr.msk.mxu0 %vm349_vm0, %v334_v9  ;;  %1223 = vmatprep.mubr.f32.mxu1 %v3911_v0 }
  0xe2   : > { %2202 = vrot.lane.b32.xlu1 %v333_v8, %s3913_s26  ;;  %2192 = vrot.lane.b32.xlu0 %v4216_v3, %s3913_s26 }
  0xe3   : > { %3371 = vmatpush1.msk.msra.mxu0 %vm349_vm0, %v4223_v7  ;;  %1152 = vmatprep.mubr.f32.mxu0 %v3911_v0 }
  0xe4   : > { %3375 = vmatmul.mubr.msk.f32.vlgmr.msra.gmra.mrb[2].mxu1 %vm345_vm1, %v940_v13  ;;  %3372 = vmatmul.mubr.msk.f32.vlgmr.msra.gmra.mrb[2].mxu0 %vm345_vm1, %v940_v13 }
  0xe5   : > { %1364 = vmatprep.mubr.f32.mxu0 %v3911_v0  ;;  %1435 = vmatprep.mubr.f32.mxu1 %v3911_v0 }
  0xe6   : > { %2206 = vrot.lane.b32.xlu1 %v334_v9, %s3913_s26  ;;  %2204 = vrot.lane.b32.xlu0 %v4223_v7, %s3913_s26 }
  0xe7   : > { %3648 = vset.pattern.permute.xlu0 %v3914_v15 }
  0xea   : > { %2210 = vrot.lane.b32.xlu1 %v340_v12, %s3913_s26  ;;  %2208 = vrot.lane.b32.xlu0 %v326_v10, %s3913_s26 }
  0xee   : > { %3147 = vperm.xlu0 %3648, %v3144_v14  }
 0x138   : > { %v1247_v18 = vpop.permute.xlu1 %1246  ;;  %v1243_v19 = vpop.permute.xlu0 %1242 }
 0x13c   : > { %v1245_v20 = vpop.permute.xlu1 %1244  ;;  %v1239_v21 = vpop.permute.xlu0 %1238 }
 0x13d   : > { %v1266_v22 = vsel %vm1260_vm2, %v1245_v20, %v1247_v18  ;;  %v1267_v23 = vsel %vm1260_vm2, %v1243_v19, %v1245_v20 }
 0x13e   : > { %3379 = vmatprep.subr.msk.mxu1 %vm349_vm0, %v1266_v22 }
 0x13f   : > { %3380 = vmatpush1.msk.msra.mxu1 %vm349_vm0, %v1267_v23 }
 0x140   : > { %v1249_v25 = vpop.permute.xlu1 %1248  ;;  %v1241_v26 = vpop.permute.xlu0 %1240  ;;  %3381 = vmatmul.mubr.msk.f32.vlgmr.msra.gmra.mrb[0].mxu1 %vm345_vm1, %v1272_v24 }
 0x141   : > { %v1268_v27 = vsel %vm1260_vm2, %v1241_v26, %v1243_v19  ;;  %v1269_v28 = vsel %vm1260_vm2, %v1239_v21, %v1241_v26  ;;  %1577 = vmatprep.mubr.f32.mxu1 %v3911_v0  ;;  %v1265_v32 = vsel %vm1260_vm2, %v1247_v18, %v1249_v25 }
 0x142   : > { %3376 = vmatprep.subr.msk.mxu0 %vm349_vm0, %v1268_v27 }
 0x143   : > { %3377 = vmatpush1.msk.msra.mxu0 %vm349_vm0, %v1269_v28 }
 0x144   : > { %v1253_v29 = vpop.permute.xlu1 %1252  ;;  %v1251_v30 = vpop.permute.xlu0 %1250  ;;  %3378 = vmatmul.mubr.msk.f32.vlgmr.msra.gmra.mrb[0].mxu0 %vm345_vm1, %v1272_v24 }
 0x145   : > { %v1264_v31 = vsel %vm1260_vm2, %v1249_v25, %v1251_v30  ;;  %1506 = vmatprep.mubr.f32.mxu0 %v3911_v0  ;;  %v1263_v35 = vsel %vm1260_vm2, %v1251_v30, %v1253_v29 }
 0x146   : > { %3382 = vmatprep.subr.msk.mxu0 %vm349_vm0, %v1264_v31 }
 0x147   : > { %3383 = vmatpush1.msk.msra.mxu0 %vm349_vm0, %v1265_v32 }
 0x148   : > { %v1257_v33 = vpop.permute.xlu1 %1256  ;;  %v1255_v34 = vpop.permute.xlu0 %1254  ;;  %3384 = vmatmul.mubr.msk.f32.vlgmr.msra.gmra.mrb[2].mxu0 %vm345_vm1, %v1272_v24  ;;  %3388 = vmatprep.subr.msk.mxu0 %vm349_vm0, %v1267_v23 }
 0x149   : > { %v1262_v36 = vsel %vm1260_vm2, %v1253_v29, %v1255_v34  ;;  %3389 = vmatpush1.msk.msra.mxu0 %vm349_vm0, %v1268_v27  ;;  %1664 = vmatprep.mubr.f32.mxu0 %v3911_v0  ;;  %v1261_v40 = vsel %vm1260_vm2, %v1255_v34, %v1257_v33  ;;  %v1270_v45 = vsel %vm1260_vm2, %v1257_v33, %v1239_v21 }
 0x14a   : > { %3385 = vmatprep.subr.msk.mxu1 %vm349_vm0, %v1262_v36  ;;  %3394 = vmatprep.subr.msk.mxu0 %vm349_vm0, %v1263_v35 }
 0x14b   : > { %3386 = vmatpush1.msk.msra.mxu1 %vm349_vm0, %v1263_v35 }
 0x14c   : > { %v2197_v38 = vpop.permute.xlu1 %2196  ;;  %3387 = vmatmul.mubr.msk.f32.vlgmr.msra.gmra.mrb[2].mxu1 %vm345_vm1, %v1272_v24  ;;  %3391 = vmatprep.subr.msk.mxu1 %vm349_vm0, %v1265_v32  ;;  %v2195_v39 = vpop.permute.xlu0 %2194 }
 0x14d   : > { %3390 = vmatmul.mubr.msk.f32.vlgmr.msra.gmra.mrb[0].mxu0 %vm345_vm1, %v1593_v37  ;;  %3392 = vmatpush1.msk.msra.mxu1 %vm349_vm0, %v1266_v22  ;;  %v2220_v46 = vsel %vm2212_vm3, %v2195_v39, %v2197_v38 }
 0x14e   : > { %3395 = vmatpush1.msk.msra.mxu0 %vm349_vm0, %v1264_v31  ;;  %3397 = vmatprep.subr.msk.mxu1 %vm349_vm0, %v1261_v40 }
 0x14f   : > { %3400 = vmatprep.subr.msk.mxu0 %vm349_vm0, %v1266_v22  ;;  %1735 = vmatprep.mubr.f32.mxu1 %v3911_v0 }
 0x150   : > { %1806 = vmatprep.mubr.f32.mxu0 %v3911_v0  ;;  %v2201_v41 = vpop.permute.xlu1 %2200  ;;  %3393 = vmatmul.mubr.msk.f32.vlgmr.msra.gmra.mrb[0].mxu1 %vm345_vm1, %v1593_v37  ;;  %v2199_v42 = vpop.permute.xlu0 %2198 }
 0x151   : > { %3398 = vmatpush1.msk.msra.mxu1 %vm349_vm0, %v1262_v36  ;;  %3396 = vmatmul.mubr.msk.f32.vlgmr.msra.gmra.mrb[2].mxu0 %vm345_vm1, %v1593_v37  ;;  %v2218_v49 = vsel %vm2212_vm3, %v2199_v42, %v2201_v41  ;;  %v2219_v53 = vsel %vm2212_vm3, %v2197_v38, %v2199_v42 }
 0x152   : > { %3401 = vmatpush1.msk.msra.mxu0 %vm349_vm0, %v1267_v23  ;;  %3403 = vmatprep.subr.msk.mxu1 %vm349_vm0, %v1264_v31 }
 0x153   : > { %3406 = vmatprep.subr.msk.mxu0 %vm349_vm0, %v1262_v36  ;;  %1877 = vmatprep.mubr.f32.mxu1 %v3911_v0 }
 0x154   : > { %1964 = vmatprep.mubr.f32.mxu0 %v3911_v0  ;;  %3399 = vmatmul.mubr.msk.f32.vlgmr.msra.gmra.mrb[2].mxu1 %vm345_vm1, %v1593_v37  ;;  %v4356_v44 = vpop.permute.xlu0 %2192  ;;  %v2203_v47 = vpop.permute.xlu1 %2202 }
 0x155   : > { %3404 = vmatpush1.msk.msra.mxu1 %vm349_vm0, %v1265_v32  ;;  %3402 = vmatmul.mubr.msk.f32.vlgmr.msra.gmra.mrb[0].mxu0 %vm345_vm1, %v1893_v43  ;;  %v2221_v50 = vsel %vm2212_vm3, %v4356_v44, %v2195_v39  ;;  %v2217_v56 = vsel %vm2212_vm3, %v2201_v41, %v2203_v47 }
 0x156   : > { %3407 = vmatpush1.msk.msra.mxu0 %vm349_vm0, %v1263_v35  ;;  %3409 = vmatprep.subr.msk.mxu1 %vm349_vm0, %v1270_v45 }
 0x157   : > { %3412 = vmatprep.subr.msk.mxu0 %vm349_vm0, %v2220_v46  ;;  %2035 = vmatprep.mubr.f32.mxu1 %v3911_v0 }
 0x158   : > { %2106 = vmatprep.mubr.f32.mxu0 %v3911_v0  ;;  %3405 = vmatmul.mubr.msk.f32.vlgmr.msra.gmra.mrb[0].mxu1 %vm345_vm1, %v1893_v43  ;;  %v2205_v48 = vpop.permute.xlu0 %2204  ;;  %v2207_v54 = vpop.permute.xlu1 %2206 }
 0x159   : > { %3408 = vmatmul.mubr.msk.f32.vlgmr.msra.gmra.mrb[2].mxu0 %vm345_vm1, %v1893_v43  ;;  %3410 = vmatpush1.msk.msra.mxu1 %vm349_vm0, %v1261_v40  ;;  %v2216_v51 = vsel %vm2212_vm3, %v2203_v47, %v2205_v48  ;;  %v2215_v58 = vsel %vm2212_vm3, %v2205_v48, %v2207_v54 }
 0x15a   : > { %3413 = vmatpush1.msk.msra.mxu0 %vm349_vm0, %v2221_v50  ;;  %3415 = vmatprep.subr.msk.mxu1 %vm349_vm0, %v2218_v49 }
 0x15b   : > { %2177 = vmatprep.mubr.f32.mxu1 %v3911_v0  ;;  %2316 = vmatprep.mubr.f32.mxu0 %v3911_v0 }
 0x15c   : > { %3418 = vmatprep.subr.msk.mxu0 %vm349_vm0, %v2216_v51  ;;  %3411 = vmatmul.mubr.msk.f32.vlgmr.msra.gmra.mrb[2].mxu1 %vm345_vm1, %v1893_v43  ;;  %v2209_v55 = vpop.permute.xlu0 %2208  ;;  %v2211_v60 = vpop.permute.xlu1 %2210 }
 0x15d   : > { %3414 = vmatmul.mubr.msk.f32.vlgmr.msra.gmra.mrb[0].mxu0 %vm345_vm1, %v2224_v52  ;;  %3416 = vmatpush1.msk.msra.mxu1 %vm349_vm0, %v2219_v53  ;;  %v2214_v57 = vsel %vm2212_vm3, %v2207_v54, %v2209_v55  ;;  %v2213_v61 = vsel %vm2212_vm3, %v2209_v55, %v2211_v60  ;;  %v2222_v63 = vsel %vm2212_vm3, %v2211_v60, %v4356_v44 }
 0x15e   : > { %3419 = vmatpush1.msk.msra.mxu0 %vm349_vm0, %v2217_v56  ;;  %2387 = vmatprep.mubr.f32.mxu1 %v3911_v0 }
 0x15f   : > { %3424 = vmatprep.subr.msk.mxu0 %vm349_vm0, %v2219_v53  ;;  %2458 = vmatprep.mubr.f32.mxu0 %v3911_v0 }
 0x160   : > { %3421 = vmatprep.subr.msk.mxu1 %vm349_vm0, %v2214_v57  ;;  %3417 = vmatmul.mubr.msk.f32.vlgmr.msra.gmra.mrb[0].mxu1 %vm345_vm1, %v2224_v52 }
 0x161   : > { %3420 = vmatmul.mubr.msk.f32.vlgmr.msra.gmra.mrb[2].mxu0 %vm345_vm1, %v2224_v52  ;;  %3422 = vmatpush1.msk.msra.mxu1 %vm349_vm0, %v2215_v58 }
 0x162   : > { %3425 = vmatpush1.msk.msra.mxu0 %vm349_vm0, %v2220_v46  ;;  %3427 = vmatprep.subr.msk.mxu1 %vm349_vm0, %v2217_v56 }
 0x163   : > { %3430 = vmatprep.subr.msk.mxu0 %vm349_vm0, %v2215_v58  ;;  %2529 = vmatprep.mubr.f32.mxu1 %v3911_v0 }
 0x164   : > { %2616 = vmatprep.mubr.f32.mxu0 %v3911_v0  ;;  %3423 = vmatmul.mubr.msk.f32.vlgmr.msra.gmra.mrb[2].mxu1 %vm345_vm1, %v2224_v52 }
 0x165   : > { %3426 = vmatmul.mubr.msk.f32.vlgmr.msra.gmra.mrb[0].mxu0 %vm345_vm1, %v2545_v59  ;;  %3428 = vmatpush1.msk.msra.mxu1 %vm349_vm0, %v2218_v49 }
 0x166   : > { %3431 = vmatpush1.msk.msra.mxu0 %vm349_vm0, %v2216_v51  ;;  %3433 = vmatprep.subr.msk.mxu1 %vm349_vm0, %v2213_v61 }
 0x167   : > { %3436 = vmatprep.subr.msk.mxu0 %vm349_vm0, %v2218_v49  ;;  %2687 = vmatprep.mubr.f32.mxu1 %v3911_v0 }
 0x168   : > { %2758 = vmatprep.mubr.f32.mxu0 %v3911_v0  ;;  %3429 = vmatmul.mubr.msk.f32.vlgmr.msra.gmra.mrb[0].mxu1 %vm345_vm1, %v2545_v59 }
 0x169   : > { %3432 = vmatmul.mubr.msk.f32.vlgmr.msra.gmra.mrb[2].mxu0 %vm345_vm1, %v2545_v59  ;;  %3434 = vmatpush1.msk.msra.mxu1 %vm349_vm0, %v2214_v57 }
 0x16a   : > { %3437 = vmatpush1.msk.msra.mxu0 %vm349_vm0, %v2219_v53  ;;  %3439 = vmatprep.subr.msk.mxu1 %vm349_vm0, %v2216_v51 }
 0x16b   : > { %3442 = vmatprep.subr.msk.mxu0 %vm349_vm0, %v2214_v57  ;;  %2829 = vmatprep.mubr.f32.mxu1 %v3911_v0 }
 0x16c   : > { %2916 = vmatprep.mubr.f32.mxu0 %v3911_v0  ;;  %3435 = vmatmul.mubr.msk.f32.vlgmr.msra.gmra.mrb[2].mxu1 %vm345_vm1, %v2545_v59 }
 0x16d   : > { %3438 = vmatmul.mubr.msk.f32.vlgmr.msra.gmra.mrb[0].mxu0 %vm345_vm1, %v2845_v62  ;;  %3440 = vmatpush1.msk.msra.mxu1 %vm349_vm0, %v2217_v56  ;;  %v3148_v1 = vpop.permute.xlu0 %3147 }
 0x16e   : > { %3443 = vmatpush1.msk.msra.mxu0 %vm349_vm0, %v2215_v58  ;;  %3445 = vmatprep.subr.msk.mxu1 %vm349_vm0, %v2222_v63 }
 0x16f   : > { %2987 = vmatprep.mubr.f32.mxu1 %v3911_v0  ;;  %3058 = vmatprep.mubr.f32.mxu0 %v3911_v0 }
 0x170   : > { %3441 = vmatmul.mubr.msk.f32.vlgmr.msra.gmra.mrb[0].mxu1 %vm345_vm1, %v2845_v62 }
 0x171   : > { %3444 = vmatmul.mubr.msk.f32.vlgmr.msra.gmra.mrb[2].mxu0 %vm345_vm1, %v2845_v62  ;;  %3446 = vmatpush1.msk.msra.mxu1 %vm349_vm0, %v2213_v61 }
 0x172   : > { %3129 = vmatprep.mubr.f32.mxu1 %v3911_v0 }
 0x174   : > { %3447 = vmatmul.mubr.msk.f32.vlgmr.msra.gmra.mrb[2].mxu1 %vm345_vm1, %v2845_v62 }
 0x240   : > { %v2918_v2 = vpop.f32.mrb[0].mxu0 }
 0x241   : > { %v3150_v3 = vadd.f32 %v3148_v1, %v2918_v2  ;;  %v2920_v4 = vpop.f32.mrb[1].mxu0 }
 0x242   : > { %v3151_v5 = vadd.f32 %v3148_v1, %v2920_v4 }
 0x243   : > { %3158 = vst [vmem:[%s312_s12] sm:$0xff] %v3150_v3  ;;  %v2989_v6 = vpop.f32.mrb[0].mxu1 }
 0x244   : > { %3159 = vst [vmem:[%s312_s12 + $0x8] sm:$0xff] %v3151_v5  ;;  %v3152_v7 = vadd.f32 %v3148_v1, %v2989_v6  ;;  %v3060_v8 = vpop.f32.mrb[2].mxu0  ;;  %v2991_v9 = vpop.f32.mrb[1].mxu1 }
 0x245   : > { %v3154_v10 = vadd.f32 %v3148_v1, %v3060_v8  ;;  %v3153_v0 = vadd.f32 %v3148_v1, %v2991_v9  ;;  %v3062_v11 = vpop.f32.mrb[3].mxu0 }
 0x246   : > { %3160 = vst [vmem:[%s312_s12 + $0x10] sm:$0xff] %v3152_v7  ;;  %v3155_v12 = vadd.f32 %v3148_v1, %v3062_v11 }
 0x247   : > { %3162 = vst [vmem:[%s312_s12 + $0x20] sm:$0xff] %v3154_v10  ;;  %3161 = vst [vmem:[%s312_s12 + $0x18] sm:$0xff] %v3153_v0  ;;  %v3131_v13 = vpop.f32.mrb[2].mxu1 }
 0x248   : > { %3163 = vst [vmem:[%s312_s12 + $0x28] sm:$0xff] %v3155_v12  ;;  %v3156_v14 = vadd.f32 %v3148_v1, %v3131_v13  ;;  %v3133_v15 = vpop.f32.mrb[3].mxu1 }
 0x249   : > { %v3157_v16 = vadd.f32 %v3148_v1, %v3133_v15 }
 0x24a   : > { %3164 = vst [vmem:[%s312_s12 + $0x30] sm:$0xff] %v3156_v14 }
 0x24b   : > { %3165 = vst [vmem:[%s312_s12 + $0x38] sm:$0xff] %v3157_v16 }
 0x24c   : > { %3780 = shalt.err (!%p3777_p7)
}
 0x24d   : > { %s3781_s13 = scalar_lea.hbm %s4447_s18, 1024  ;;  %s3785_s26 = scalar_lea.hbm %s4567_s6, 4096 }
 0x24e   : > { %p3782_p0 = scmp.ne.s32.totalorder %s4447_s18, %s3781_s13  ;;  %p3786_p2 = scmp.lt.u32.totalorder %s4447_s18, %s4567_s6 }
 0x24f   : > { %p3787_p5 = scmp.lt.u32.totalorder %s3785_s26, %s3781_s13  ;;  %p3789_p12 = scmp.lt.u32.totalorder %s3781_s13, %s4447_s18 }
 0x250   : > { %p3783_p3 = pnand %p3782_p0, %p4568_p8 }
 0x251   : > { %p3788_p11 = por %p3787_p5, %p3786_p2 }
 0x252   : > { %p3784_p4 = pneg %p3783_p3 }
 0x253   : > { %p3790_p9 = por %p3789_p12, %p3788_p11 }
 0x255   : > { %p3791_p1 = pnand %p3790_p9, %p3784_p4 }
 0x257   : > { %3794 = shalt.err (!%p3791_p1)
}
 0x258   : > { %3534 = dma.vmem_to_hbm [thread:$0]  (%p4568_p8), %s4449_s7, 1024, %s4447_s18, %s3167_s21  }
 0x259 PF: > { %s4569_s30 = sld [smem:[#allocation16_spill]]  ;;  %s4570_s22 = sld [smem:[#allocation25_spill]] }
 0x25a   : > { %p3551_p6 = scmp.ge.s32.totalorder %s3903_s25, 2 }
 0x25f   : > { %s3195_s29 = sand.u32 1, %s4569_s30   ;;  %p4571_p10 = scmp.ne.s32.totalorder %s4570_s22, 0 }
 0x260   : > { %s3196_s12 = scalar_lea.sflag [#allocation4], %s3195_s29 }
 0x261   : > { %p3544_p13 = pnand %p3551_p6, %p4571_p10 }
 0x263   : > { %3856 = dma.done.wait (!%p3544_p13), %s3196_s12, 1024  }
 0x264   : > { %3858 = vsyncadd (!%p3544_p13), %s3196_s12, 4294966272  ;;  %s24_s25 = sadd.s32 1, %s3903_s25   ;;  %s4572_s2 = sld [smem:[#allocation23_spill]] }
 0x265   : > { %p21_p7 = scmp.ge.s32.totalorder %s24_s25, 6   ;;  %s4573_s20 = sld [smem:[#allocation17_spill]] }
 0x266   : > { %s4574_s3 = sld [smem:[#allocation22_spill]]  ;;  %s4575_s7 = sld [smem:[#allocation20_spill]] }
 0x267   : > { %s4576_s27 = sld [smem:[#allocation21_spill]]  ;;  %s4577_s15 = smov %s3867_s16 }
 0x268   : > { %s4578_s16 = smov %s3871_s17  ;;  %s4580_s18 = smov %s3879_s19 }
 0x269   : > { %s4583_s21 = smov %s3895_s23  ;;  %s4584_s22 = smov %s3899_s24 }
 0x26a   : > { %s4579_s17 = smov %s4572_s2  ;;  %23 = sbr.rel (!%p21_p7) target bundleno = 16 (0x10), region = 110 }
 0x26b   : > { %s4581_s19 = smov %s4573_s20 }
 0x26c   : > { %s4582_s20 = smov %s4574_s3  ;;  %s4585_s23 = smov %s4575_s7 }
 0x26d   : > { %s4586_s24 = smov %s4576_s27 }
 0x271   :  { %3201 = vsyncpa [#allocation3], 1 }
 0x272   :  { %3203 = vsyncpa [#allocation3 + $0x1], 1 }
 0x273   :  { %3204 = vsyncpa [#allocation6], 1 }
 0x274   :  { %3206 = vsyncpa [#allocation6 + $0x1], 1 }
 0x275   :  { %3207 = vsyncpa [#allocation9], 1 }
 0x276   :  { %3208 = vsyncpa [#allocation4], 1 }
 0x277   :  { %3210 = vsyncpa [#allocation4 + $0x1], 1 }

</bundles_post_ra>
